<compile_context>
chip_gen: v7x
topology: tpu7x:2x2x1
jax: 0.10.0
libtpu: 0.0.40
codegen_flags: <defaults>
</compile_context>

<pallas_src>
import jax
import jax.numpy as jnp
from jax.experimental import pallas as pl
from jax.experimental.pallas import tpu as pltpu


def _round_up(n, m):
    return ((n + m - 1) // m) * m


def classify_kernel(x_ref, w3_ref, b3_ref, w4_ref, b4_ref,
                    logits_ref, probs_ref):
    # fc3 + ReLU:  (TB, 100) @ (100, 32) + (1, 32) -> (TB, 32)
    h = jnp.dot(x_ref[...], w3_ref[...],
                preferred_element_type=jnp.float32) + b3_ref[...]
    h = jnp.maximum(h, 0.0)

    # fc4:  (TB, 32) @ (32, 2) + (1, 2) -> (TB, 2)
    logits = jnp.dot(h, w4_ref[...].astype(h.dtype),
                     preferred_element_type=jnp.float32) + b4_ref[...]
    logits_ref[...] = logits.astype(logits_ref.dtype)

    # 2-class softmax in sigmoid form (numerically stable, no lane reductions):
    #   softmax([l0, l1]) = [sigmoid(l0 - l1), sigmoid(l1 - l0)]
    d = logits[:, 0:1] - logits[:, 1:2]
    p0 = 1.0 / (1.0 + jnp.exp(-d))
    p1 = 1.0 - p0
    probs_ref[...] = jnp.concatenate([p0, p1], axis=-1).astype(probs_ref.dtype)


def classify_forward(x, w3, b3, w4, b4, *, tile_b=2048):
    """x: (B, 100).  Returns (logits (B, 2), softmax (B, 2)) as float32."""
    B, D = x.shape
    n_hidden = w3.shape[1]
    n_cls = w4.shape[1]
    assert w3.shape[0] == D and w4.shape[0] == n_hidden

    # Batch tile: large for real batches (amortize per-step overhead, hide DMA),
    # clamped + 8-aligned for small ones.
    tb = min(tile_b, _round_up(B, 8))
    tb = _round_up(tb, 8)
    B_pad = _round_up(B, tb)
    if B_pad != B:
        x = jnp.pad(x, ((0, B_pad - B), (0, 0)))

    grid = (B_pad // tb,)

    flops = 2 * B_pad * (D * n_hidden + n_hidden * n_cls)
    bytes_accessed = (
        B_pad * D * x.dtype.itemsize                       # x stream (dominant)
        + w3.size * w3.dtype.itemsize + b3.size * b3.dtype.itemsize
        + w4.size * w4.dtype.itemsize + b4.size * b4.dtype.itemsize
        + 2 * B_pad * n_cls * 4                            # logits + probs
    )

    logits, probs = pl.pallas_call(
        classify_kernel,
        out_shape=(
            jax.ShapeDtypeStruct((B_pad, n_cls), jnp.float32),  # logits
            jax.ShapeDtypeStruct((B_pad, n_cls), jnp.float32),  # softmax probs
        ),
        grid=grid,
        in_specs=[
            pl.BlockSpec((tb, D), lambda i: (i, 0)),        # x: streamed, double-buffered
            pl.BlockSpec(w3.shape, lambda i: (0, 0)),       # weights/biases: VMEM-resident
            pl.BlockSpec(b3.shape, lambda i: (0, 0)),
            pl.BlockSpec(w4.shape, lambda i: (0, 0)),
            pl.BlockSpec(b4.shape, lambda i: (0, 0)),
        ],
        out_specs=(
            pl.BlockSpec((tb, n_cls), lambda i: (i, 0)),
            pl.BlockSpec((tb, n_cls), lambda i: (i, 0)),
        ),
        compiler_params=pltpu.CompilerParams(
            dimension_semantics=("parallel",),              # megacore-shardable batch axis
            vmem_limit_bytes=32 * 1024 * 1024,
        ),
        cost_estimate=pl.CostEstimate(
            flops=flops, transcendentals=B_pad, bytes_accessed=bytes_accessed),
    )(x, w3, b3, w4, b4)

    if B_pad != B:
        logits = logits[:B]
        probs = probs[:B]
    return logits, probs


def init_linear(key, in_features, out_features):
    """torch.nn.Linear-style init (uniform +/- 1/sqrt(fan_in)); weight is
    returned pre-transposed as (in_features, out_features)."""
    kw, kb = jax.random.split(key)
    bound = 1.0 / jnp.sqrt(jnp.float32(in_features))
    w = jax.random.uniform(kw, (in_features, out_features), jnp.float32,
                           minval=-bound, maxval=bound)
    b = jax.random.uniform(kb, (1, out_features), jnp.float32,
                           minval=-bound, maxval=bound)
    return w, b


def _reference(x, w3, b3, w4, b4):
    h = jnp.maximum(x @ w3 + b3, 0.0)
    logits = h @ w4 + b4
    return logits, jax.nn.softmax(logits, axis=1)


if __name__ == "__main__":
    key = jax.random.PRNGKey(0)
    k_x, k_x2, k_fc3, k_fc4 = jax.random.split(key, 4)

    # Only fc3 / fc4 participate in forward.
    w3, b3 = init_linear(k_fc3, 100, 32)
    w4, b4 = init_linear(k_fc4, 32, 2)

    # Small batch, single grid step.
    B = 8
    x = jax.random.normal(k_x, (B, 100), jnp.float32)
    logits, probs = classify_forward(x, w3, b3, w4, b4)
    jax.block_until_ready((logits, probs))
    logits_ref, probs_ref = _reference(x, w3, b3, w4, b4)
    assert jnp.allclose(logits, logits_ref, atol=1e-5, rtol=1e-5)
    assert jnp.allclose(probs, probs_ref, atol=1e-5, rtol=1e-5)

    # Exercise the batch grid + ragged-tail padding path (multiple tiles).
    B2 = 300
    x2 = jax.random.normal(k_x2, (B2, 100), jnp.float32)
    logits2, probs2 = classify_forward(x2, w3, b3, w4, b4, tile_b=128)
    jax.block_until_ready((logits2, probs2))
    logits2_ref, probs2_ref = _reference(x2, w3, b3, w4, b4)
    assert logits2.shape == (B2, 2) and probs2.shape == (B2, 2)
    assert jnp.allclose(logits2, logits2_ref, atol=1e-5, rtol=1e-5)
    assert jnp.allclose(probs2, probs2_ref, atol=1e-5, rtol=1e-5)

    print("KERNEL_OK")
</pallas_src>

<mosaic_0001>
module attributes {stable_mosaic.version = 11 : i64} {
  func.func @classify_kernel(%arg0: i32, %arg1: memref<8x100xf32, #tpu.memory_space<vmem>>, %arg2: memref<100x32xf32, #tpu.memory_space<vmem>>, %arg3: memref<1x32xf32, #tpu.memory_space<vmem>>, %arg4: memref<32x2xf32, #tpu.memory_space<vmem>>, %arg5: memref<1x2xf32, #tpu.memory_space<vmem>>, %arg6: memref<8x2xf32, #tpu.memory_space<vmem>>, %arg7: memref<8x2xf32, #tpu.memory_space<vmem>>) attributes {dimension_semantics = [#tpu.dimension_semantics<parallel>], iteration_bounds = array<i64: 1>, scalar_prefetch = 0 : i64, scratch_operands = 0 : i64, tpu.core_type = #tpu.core_type<tc>, window_params = [{transform_indices = @transform_0, window_bounds = array<i64: 8, 100>}, {pipeline_mode = #tpu.pipeline_mode<synchronous>, transform_indices = @transform_1, window_bounds = array<i64: 100, 32>}, {pipeline_mode = #tpu.pipeline_mode<synchronous>, transform_indices = @transform_2, window_bounds = array<i64: 1, 32>}, {pipeline_mode = #tpu.pipeline_mode<synchronous>, transform_indices = @transform_3, window_bounds = array<i64: 32, 2>}, {pipeline_mode = #tpu.pipeline_mode<synchronous>, transform_indices = @transform_4, window_bounds = array<i64: 1, 2>}, {transform_indices = @transform_5, window_bounds = array<i64: 8, 2>}, {transform_indices = @transform_6, window_bounds = array<i64: 8, 2>}]} {
    %c0 = arith.constant 0 : index
    %c0_0 = arith.constant 0 : index
    %0 = vector.load %arg1[%c0, %c0_0] : memref<8x100xf32, #tpu.memory_space<vmem>>, vector<8x100xf32>
    %c0_1 = arith.constant 0 : index
    %c0_2 = arith.constant 0 : index
    %1 = vector.load %arg2[%c0_1, %c0_2] : memref<100x32xf32, #tpu.memory_space<vmem>>, vector<100x32xf32>
    %cst = arith.constant dense<0.000000e+00> : vector<8x32xf32>
    %2 = tpu.matmul %0, %1, %cst {dimension_numbers = #tpu.dot_dimension_numbers<[1], [0], [0], [1], [0, 0, 1, 1], [], []>} : vector<8x100xf32>, vector<100x32xf32>, vector<8x32xf32> -> vector<8x32xf32>
    %c0_3 = arith.constant 0 : index
    %c0_4 = arith.constant 0 : index
    %3 = vector.load %arg3[%c0_3, %c0_4] : memref<1x32xf32, #tpu.memory_space<vmem>>, vector<1x32xf32>
    %4 = vector.broadcast %3 : vector<1x32xf32> to vector<8x32xf32>
    %5 = arith.addf %2, %4 : vector<8x32xf32>
    %cst_5 = arith.constant 0.000000e+00 : f32
    %6 = vector.broadcast %cst_5 : f32 to vector<8x32xf32>
    %7 = arith.maximumf %5, %6 : vector<8x32xf32>
    %c0_6 = arith.constant 0 : index
    %c0_7 = arith.constant 0 : index
    %8 = vector.load %arg4[%c0_6, %c0_7] : memref<32x2xf32, #tpu.memory_space<vmem>>, vector<32x2xf32>
    %cst_8 = arith.constant dense<0.000000e+00> : vector<8x2xf32>
    %9 = tpu.matmul %7, %8, %cst_8 {dimension_numbers = #tpu.dot_dimension_numbers<[1], [0], [0], [1], [0, 0, 1, 1], [], []>} : vector<8x32xf32>, vector<32x2xf32>, vector<8x2xf32> -> vector<8x2xf32>
    %c0_9 = arith.constant 0 : index
    %c0_10 = arith.constant 0 : index
    %10 = vector.load %arg5[%c0_9, %c0_10] : memref<1x2xf32, #tpu.memory_space<vmem>>, vector<1x2xf32>
    %11 = vector.broadcast %10 : vector<1x2xf32> to vector<8x2xf32>
    %12 = arith.addf %9, %11 : vector<8x2xf32>
    %c0_11 = arith.constant 0 : index
    %c0_12 = arith.constant 0 : index
    %13 = vector.load %arg6[%c0_11, %c0_12] : memref<8x2xf32, #tpu.memory_space<vmem>>, vector<8x2xf32>
    tpu.vector_store %arg6[%c0_11, %c0_12], %12 {strides = array<i32>} : memref<8x2xf32, #tpu.memory_space<vmem>>, vector<8x2xf32>,
    %14 = vector.extract_strided_slice %12 {offsets = [0, 0], sizes = [8, 1], strides = [1, 1]} : vector<8x2xf32> to vector<8x1xf32>
    %15 = vector.extract_strided_slice %12 {offsets = [0, 1], sizes = [8, 1], strides = [1, 1]} : vector<8x2xf32> to vector<8x1xf32>
    %16 = arith.subf %14, %15 : vector<8x1xf32>
    %cst_13 = arith.constant 0.000000e+00 : f32
    %17 = vector.broadcast %cst_13 : f32 to vector<8x1xf32>
    %18 = arith.subf %17, %16 : vector<8x1xf32>
    %19 = math.exp %18 : vector<8x1xf32>
    %cst_14 = arith.constant 1.000000e+00 : f32
    %20 = vector.broadcast %cst_14 : f32 to vector<8x1xf32>
    %21 = arith.addf %20, %19 : vector<8x1xf32>
    %cst_15 = arith.constant 1.000000e+00 : f32
    %22 = vector.broadcast %cst_15 : f32 to vector<8x1xf32>
    %23 = arith.divf %22, %21 : vector<8x1xf32>
    %cst_16 = arith.constant 1.000000e+00 : f32
    %24 = vector.broadcast %cst_16 : f32 to vector<8x1xf32>
    %25 = arith.subf %24, %23 : vector<8x1xf32>
    %26 = tpu.concatenate %23, %25 in 1 : vector<8x1xf32>, vector<8x1xf32> -> vector<8x2xf32>
    %c0_17 = arith.constant 0 : index
    %c0_18 = arith.constant 0 : index
    %27 = vector.load %arg7[%c0_17, %c0_18] : memref<8x2xf32, #tpu.memory_space<vmem>>, vector<8x2xf32>
    tpu.vector_store %arg7[%c0_17, %c0_18], %26 {strides = array<i32>} : memref<8x2xf32, #tpu.memory_space<vmem>>, vector<8x2xf32>,
    return
  }
  func.func @transform_0(%arg0: i32) -> (i32, i32) {
    %c0_i32 = arith.constant 0 : i32
    %c0_i32_0 = arith.constant 0 : i32
    return %arg0, %c0_i32 : i32, i32
  }
  func.func @transform_1(%arg0: i32) -> (i32, i32) {
    %c0_i32 = arith.constant 0 : i32
    %c0_i32_0 = arith.constant 0 : i32
    %c0_i32_1 = arith.constant 0 : i32
    return %c0_i32, %c0_i32_0 : i32, i32
  }
  func.func @transform_2(%arg0: i32) -> (i32, i32) {
    %c0_i32 = arith.constant 0 : i32
    %c0_i32_0 = arith.constant 0 : i32
    %c0_i32_1 = arith.constant 0 : i32
    return %c0_i32, %c0_i32_0 : i32, i32
  }
  func.func @transform_3(%arg0: i32) -> (i32, i32) {
    %c0_i32 = arith.constant 0 : i32
    %c0_i32_0 = arith.constant 0 : i32
    %c0_i32_1 = arith.constant 0 : i32
    return %c0_i32, %c0_i32_0 : i32, i32
  }
  func.func @transform_4(%arg0: i32) -> (i32, i32) {
    %c0_i32 = arith.constant 0 : i32
    %c0_i32_0 = arith.constant 0 : i32
    %c0_i32_1 = arith.constant 0 : i32
    return %c0_i32, %c0_i32_0 : i32, i32
  }
  func.func @transform_5(%arg0: i32) -> (i32, i32) {
    %c0_i32 = arith.constant 0 : i32
    %c0_i32_0 = arith.constant 0 : i32
    return %arg0, %c0_i32 : i32, i32
  }
  func.func @transform_6(%arg0: i32) -> (i32, i32) {
    %c0_i32 = arith.constant 0 : i32
    %c0_i32_0 = arith.constant 0 : i32
    return %arg0, %c0_i32 : i32, i32
  }
}

</mosaic_0001>

<bundles_post_ra>
// kernel: tpu_custom_call.1
= control target key start
LH: loop header
LB: loop body
LE: loop exit
PB: predicated region body
PF: predicated region fallthrough
CT: control target
= control target key end

     0   :  { %v333_v0 = vmov 0.0|0.0   ;;  %vm334_vm0 = vmmov 0   ;;  %v335_v4 = vmov 0.0   ;;  %vm47_vm1 = vcmask 1043456   ;;  %s441_s1 = inlined_call_operand.vmem [shape: f32[100,32], index: 1, kind: input, shape index: {}]   ;;  %s442_s3 = inlined_call_operand.vmem [shape: f32[32,2], index: 3, kind: input, shape index: {}]   ;;  %s443_s0 = inlined_call_operand.vmem [shape: f32[8,100], index: 0, kind: input, shape index: {}]   ;;  %s444_s2 = inlined_call_operand.vmem [shape: f32[1,32], index: 2, kind: input, shape index: {}]   ;;  %s445_s4 = inlined_call_operand.vmem [shape: f32[1,2], index: 4, kind: input, shape index: {}]   ;;  %s446_s5 = inlined_call_operand.vmem [shape: f32[8,2], index: 5, kind: output, shape index: {0}]   ;;  %s447_s6 = inlined_call_operand.vmem [shape: f32[8,2], index: 6, kind: output, shape index: {1}]  }
   0x1   :  { %300 = vmatprep.subr.bf16.mxu0 %v333_v0  ;;  %v23_v1 = vld [vmem:[%s441_s1] sm:$0xff]  ;;  %v24_v2 = vld [vmem:[%s441_s1 + $0x8] sm:$0xff]  ;;  %v25_v3 = vld [vmem:[%s441_s1 + $0x10] sm:$0xff]  ;;  %286 = vmatprep.mubr.msk.f32.mxu0 %vm334_vm0, %v335_v4  ;;  %vm43_vm2 = vcmask 818176   ;;  %vm133_vm3 = vcmask 261120   ;;  %vm207_vm4 = vcmask 15360  }
   0x2   :  { %v301_v5 = vpack.c.bf16 %v24_v2, %v23_v1  ;;  %v26_v6 = vld [vmem:[%s441_s1 + $0x18] sm:$0xff]  ;;  %318 = vmatprep.subr.bf16.mxu1 %v333_v0  ;;  %297 = vmatprep.mubr.msk.f32.mxu1 %vm334_vm0, %v335_v4  ;;  %v27_v8 = vld [vmem:[%s441_s1 + $0x20] sm:$0xff]  ;;  %v28_v9 = vld [vmem:[%s441_s1 + $0x28] sm:$0xff]  ;;  %vm225_vm5 = vcmask 7168  }
   0x3   :  { %v304_v7 = vpack.c.bf16 %v26_v6, %v25_v3  ;;  %v122_v10 = vld [vmem:[%s442_s3] sm:$0xff]  ;;  %v123_v11 = vld [vmem:[%s442_s3 + $0x8] sm:$0xff]  ;;  %v307_v13 = vpack.c.bf16 %v28_v9, %v27_v8  ;;  %v29_v14 = vld [vmem:[%s441_s1 + $0x30] sm:$0xff] }
   0x4   :  { %302 = vmatpush3.bf16.msra.mxu0 %v301_v5  ;;  %v319_v12 = vpack.c.bf16 %v123_v11, %v122_v10  ;;  %v30_v15 = vld [vmem:[%s441_s1 + $0x38] sm:$0xff]  ;;  %v31_v17 = vld [vmem:[%s441_s1 + $0x40] sm:$0xff]  ;;  %v32_v18 = vld [vmem:[%s441_s1 + $0x48] sm:$0xff] }
   0x5   :  { %303 = vmatprep.subr.bf16.mxu0 %v333_v0  ;;  %v310_v16 = vpack.c.bf16 %v30_v15, %v29_v14  ;;  %v313_v19 = vpack.c.bf16 %v32_v18, %v31_v17  ;;  %v33_v20 = vld [vmem:[%s441_s1 + $0x50] sm:$0xff]  ;;  %v34_v21 = vld [vmem:[%s441_s1 + $0x58] sm:$0xff]  ;;  %v35_v23 = vld [vmem:[%s441_s1 + $0x60] sm:$0xf] }
   0x6   :  { %320 = vmatpush3.bf16.msra.mxu1 %v319_v12  ;;  %v316_v22 = vpack.c.bf16 %v34_v21, %v33_v20  ;;  %v22_v24 = vld [vmem:[%s443_s0] sm:$0xff]  ;;  %v124_v25 = vld [vmem:[%s442_s3 + $0x10] sm:$0xff]  ;;  %v125_v26 = vld [vmem:[%s442_s3 + $0x18] sm:$0xff] }
   0x7   :  { %321 = vmatprep.subr.bf16.mxu1 %v333_v0  ;;  %v322_v27 = vpack.c.bf16 %v125_v26, %v124_v25  ;;  %v236_v28 = vld [vmem:[%s444_s2] ss:$0 sm:$0xff]  ;;  %s336_s2 = smov 127  }
   0x8   :  { %305 = vmatpush3.bf16.msra.mxu0 %v304_v7  ;;  %v239_v33 = vld [vmem:[%s445_s4] ss:$0 sm:$0xff]  ;;  %s337_s4 = smov 1  }
   0x9   :  { %306 = vmatprep.subr.bf16.mxu0 %v333_v0 }
   0xa   :  { %323 = vmatpush3.bf16.msra.mxu1 %v322_v27 }
   0xc   :  { %308 = vmatpush3.bf16.msra.mxu0 %v307_v13 }
   0xd   :  { %309 = vmatprep.subr.bf16.mxu0 %v333_v0 }
  0x10   :  { %311 = vmatpush3.bf16.msra.mxu0 %v310_v16 }
  0x11   :  { %312 = vmatprep.subr.bf16.mxu0 %v333_v0 }
  0x14   :  { %314 = vmatpush3.bf16.msra.mxu0 %v313_v19 }
  0x15   :  { %315 = vmatprep.subr.bf16.mxu0 %v333_v0 }
  0x18   :  { %317 = vmatpush3.bf16.msra.mxu0 %v316_v22 }
  0x19   :  { %284 = vmatprep.subr.mxu0 %v335_v4 }
  0x1c   :  { %285 = vmatpush3.msk.msra.mxu0 %vm47_vm1, %v35_v23 }
  0x1d   :  { %287 = vmatmul.mubr.msk.f32.vlgmr.msra.gmra.mrb[0].mxu0 %vm43_vm2, %v22_v24 }
  0xf0   :  { %v117_v29 = vpop.f32.mrb[0].mxu0 }
  0xf1   :  { %v118_v30 = vadd.f32 %v236_v28, %v117_v29  ;;  %v288_v31 = vpop.f32.mrb[1].mxu0 }
  0xf3   :  { %v121_v32 = vmax.f32 %v118_v30, 0.0 }
  0xf5   :  { %298 = vmatmul.mubr.msk.f32.vlgmr.msra.gmra.mrb[0].mxu1 %vm133_vm3, %v121_v32 }
 0x1c8   :  { %v203_v34 = vpop.f32.mrb[0].mxu1 }
 0x1c9   :  { %v204_v35 = vadd.f32 %v239_v33, %v203_v34  ;;  %v299_v36 = vpop.f32.mrb[1].mxu1 }
 0x1cb   :  { %208 = vst.msk [vmem:[%s446_s5] sm:$0xff] %vm207_vm4, %v204_v35  ;;  %210 = vrot.lane.b32.xlu0 %v204_v35, %s336_s2 }
 0x23d   :  { %v211_v37 = vpop.permute.xlu0 %210 }
 0x23e   :  { %v213_v38 = vsub.f32 %v204_v35, %v211_v37 }
 0x240   :  { %v214_v39 = vsub.f32 0.0, %v213_v38 }
 0x242   :  { %v215_v40 = vmul.f32 1.442695, %v214_v39 }
 0x244   :  { %329 = vpow2.f32 %v215_v40 }
 0x24e   :  { %v330_v41 = vpop.eup %329 }
 0x24f   :  { %v217_v42 = vadd.f32 1.0, %v330_v41 }
 0x251   :  { %331 = vrcp.f32 %v217_v42 }
 0x25b   :  { %v332_v43 = vpop.eup %331 }
 0x25c   :  { %v220_v44 = vsub.f32 1.0, %v332_v43 }
 0x25e   :  { %222 = vrot.lane.b32.xlu0 %v220_v44, %s337_s4 }
 0x2d0   :  { %v223_v45 = vpop.permute.xlu0 %222 }
 0x2d1   :  { %v226_v46 = vsel %vm225_vm5, %v332_v43, %v223_v45 }
 0x2d2   :  { %227 = vst.msk [vmem:[%s447_s6] sm:$0xff] %vm207_vm4, %v226_v46 }

</bundles_post_ra>
